<compile_context>
chip_gen: v5e
topology: v5e:2x2
jax: 0.10.0
libtpu: 0.0.40
codegen_flags: <defaults>
</compile_context>

<pallas_src>
import jax
import jax.numpy as jnp
from jax import lax
from jax.experimental import pallas as pl
from jax.experimental.pallas import tpu as pltpu


IN_F = 1
HID = 20
OUT_F = 1

LANES = 128             # batch mapped onto the lane axis
MAX_BLOCK_ROWS = 2048   # (2048,128) f32 = 1 MiB/block; ~4 MiB double-buffered in+out
CHUNK = 32              # inner row-chunk: ~12 live vregs << 64-vreg file
PARAM_LEN = 3 * HID + OUT_F   # [w1(20) | b1(20) | w2(20) | b2(1)]
PARAM_PAD = 64                # tidy power-of-two SMEM vector


def _round_up(a, b):
    return ((a + b - 1) // b) * b


def mlp_kernel(params_ref, x_ref, o_ref):
    """Fused Linear -> ReLU -> Linear, pure VPU.

    params_ref: SMEM f32[PARAM_PAD], layout [w1(20) | b1(20) | w2(20) | b2(1)].
    x_ref/o_ref: (block_rows, LANES) f32 tiles, batch laid out lane-dense.
    """
    block_rows = x_ref.shape[0]
    # block_rows is always a multiple of 8; it is a multiple of CHUNK whenever
    # it exceeds CHUNK, otherwise the whole block is one chunk.
    chunk = CHUNK if block_rows % CHUNK == 0 else block_rows
    n_chunks = block_rows // chunk

    def body(c, carry):
        r0 = pl.multiple_of(c * chunk, 8)
        xc = x_ref[pl.ds(r0, chunk), :]
        # Peel j=0 and fold b2 into the accumulator init
        # (saves a full-tile zero-fill and two full-tile adds).
        acc = (jnp.maximum(xc * params_ref[0] + params_ref[HID], 0.0)
               * params_ref[2 * HID]
               + params_ref[3 * HID])
        # Unrolled FMA chain: h_j = relu(x*w1_j + b1_j); acc += h_j * w2_j.
        for j in range(1, HID):
            h = jnp.maximum(xc * params_ref[j] + params_ref[HID + j], 0.0)
            acc = acc + h * params_ref[2 * HID + j]
        o_ref[pl.ds(r0, chunk), :] = acc
        return carry

    lax.fori_loop(0, n_chunks, body, 0, unroll=False)


def _choose_block_rows(rows):
    if rows < 32:
        # Tiny batch: single grid step, single chunk.
        return _round_up(max(rows, 1), 8)
    # Aim for >= 2 grid steps (so both v7x TensorCores get work), keep blocks
    # a multiple of CHUNK, and cap at MAX_BLOCK_ROWS.
    half = _round_up((rows + 1) // 2, CHUNK)
    return min(MAX_BLOCK_ROWS, half)


def pack_params(w1, b1, w2, b2):
    """Pack all ~244 B of parameters into one SMEM-resident vector.
    Called ONCE at init (hoisted out of the per-forward path)."""
    return jnp.concatenate([
        w1.reshape(-1).astype(jnp.float32),
        b1.reshape(-1).astype(jnp.float32),
        w2.reshape(-1).astype(jnp.float32),
        b2.reshape(-1).astype(jnp.float32),
        jnp.zeros((PARAM_PAD - PARAM_LEN,), jnp.float32),
    ])


@jax.jit
def net_forward(params, x):
    """params: packed f32[PARAM_PAD] from pack_params().  x: (N, 1) f32."""
    n = x.shape[0]
    rows = pl.cdiv(n, LANES)
    block_rows = _choose_block_rows(rows)
    grid = (pl.cdiv(rows, block_rows),)

    # Lane-dense layout: flatten batch onto (rows, 128). Pad only the tail
    # (<= 127 elements); no pad/slice at all when N % 128 == 0.
    n_flat = rows * LANES
    xf = x.reshape(-1)
    if n_flat != n:
        xf = jnp.pad(xf, (0, n_flat - n))
    x2d = xf.reshape(rows, LANES)

    out2d = pl.pallas_call(
        mlp_kernel,
        out_shape=jax.ShapeDtypeStruct((rows, LANES), jnp.float32),
        grid_spec=pltpu.PrefetchScalarGridSpec(
            num_scalar_prefetch=0,
            grid=grid,
            in_specs=[
                # Packed weights/biases: whole array, resident in SMEM.
                pl.BlockSpec(memory_space=pltpu.MemorySpace.SMEM),
                # Lane-dense batch tile (partial last block handled by Pallas).
                pl.BlockSpec((block_rows, LANES), lambda i: (i, 0)),
            ],
            out_specs=pl.BlockSpec((block_rows, LANES), lambda i: (i, 0)),
        ),
        compiler_params=pltpu.CompilerParams(
            dimension_semantics=("parallel",),   # megacore sharding on v7x
        ),
    )(params, x2d)

    outf = out2d.reshape(-1)
    if n_flat != n:
        outf = outf[:n]
    return outf.reshape(n, OUT_F)


def init_params(key):
    # Mirror torch.nn.Linear default init: U(-1/sqrt(fan_in), 1/sqrt(fan_in)).
    k1, k2, k3, k4 = jax.random.split(key, 4)
    bound1 = 1.0 / jnp.sqrt(jnp.float32(IN_F))
    bound2 = 1.0 / jnp.sqrt(jnp.float32(HID))
    w1 = jax.random.uniform(k1, (IN_F, HID), jnp.float32, -bound1, bound1)
    b1 = jax.random.uniform(k2, (1, HID), jnp.float32, -bound1, bound1)
    w2 = jax.random.uniform(k3, (HID, OUT_F), jnp.float32, -bound2, bound2)
    b2 = jax.random.uniform(k4, (1, OUT_F), jnp.float32, -bound2, bound2)
    return w1, b1, w2, b2


if __name__ == "__main__":
    key = jax.random.PRNGKey(0)
    w1, b1, w2, b2 = init_params(key)
    params = pack_params(w1, b1, w2, b2)   # packed once, outside the call path

    # Same data as the PyTorch module: x = linspace(-1, 1, 1000).unsqueeze(1).
    N = 1000
    x = jnp.linspace(-1.0, 1.0, N, dtype=jnp.float32).reshape(N, 1)

    out = net_forward(params, x)
    out = jax.block_until_ready(out)

    # Pure-JAX reference of the fused Linear -> ReLU -> Linear.
    ref = jnp.maximum(x @ w1 + b1, 0.0) @ w2 + b2
    assert out.shape == (N, OUT_F)
    assert jnp.allclose(out, ref, atol=1e-5, rtol=1e-5)

    # Also exercise the multi-step grid / partial-last-block / tail-pad path.
    N2 = 8492   # rows=67 -> block_rows=64 -> 2 grid steps, last block partial
    x2 = jnp.linspace(-1.0, 1.0, N2, dtype=jnp.float32).reshape(N2, 1)
    out2 = jax.block_until_ready(net_forward(params, x2))
    ref2 = jnp.maximum(x2 @ w1 + b1, 0.0) @ w2 + b2
    assert out2.shape == (N2, OUT_F)
    assert jnp.allclose(out2, ref2, atol=1e-5, rtol=1e-5)

    print("KERNEL_OK")
</pallas_src>

<mosaic_0001>
module attributes {stable_mosaic.version = 11 : i64} {
  func.func @mlp_kernel(%arg0: i32, %arg1: memref<64xf32, #tpu.memory_space<smem>>, %arg2: memref<8x128xf32, #tpu.memory_space<vmem>>, %arg3: memref<8x128xf32, #tpu.memory_space<vmem>>) attributes {dimension_semantics = [#tpu.dimension_semantics<parallel>], iteration_bounds = array<i64: 1>, scalar_prefetch = 0 : i64, scratch_operands = 0 : i64, tpu.core_type = #tpu.core_type<tc>, window_params = [{transform_indices = @transform_0, window_bounds = array<i64: 64>}, {transform_indices = @transform_1, window_bounds = array<i64: 8, 128>}, {transform_indices = @transform_2, window_bounds = array<i64: 8, 128>}]} {
    %c0_i32 = arith.constant 0 : i32
    %c8_i32 = arith.constant 8 : i32
    %0 = arith.muli %c0_i32, %c8_i32 : i32
    %1 = tpu.assume_multiple %0, 8 : i32
    %2 = arith.index_cast %1 : i32 to index
    %c0 = arith.constant 0 : index
    %3 = vector.load %arg2[%2, %c0] : memref<8x128xf32, #tpu.memory_space<vmem>>, vector<8x128xf32>
    %c0_0 = arith.constant 0 : index
    %4 = memref.load %arg1[%c0_0] : memref<64xf32, #tpu.memory_space<smem>>
    %5 = vector.broadcast %4 : f32 to vector<8x128xf32>
    %6 = arith.mulf %3, %5 : vector<8x128xf32>
    %c20 = arith.constant 20 : index
    %7 = memref.load %arg1[%c20] : memref<64xf32, #tpu.memory_space<smem>>
    %8 = vector.broadcast %7 : f32 to vector<8x128xf32>
    %9 = arith.addf %6, %8 : vector<8x128xf32>
    %cst = arith.constant 0.000000e+00 : f32
    %10 = vector.broadcast %cst : f32 to vector<8x128xf32>
    %11 = arith.maximumf %9, %10 : vector<8x128xf32>
    %c40 = arith.constant 40 : index
    %12 = memref.load %arg1[%c40] : memref<64xf32, #tpu.memory_space<smem>>
    %13 = vector.broadcast %12 : f32 to vector<8x128xf32>
    %14 = arith.mulf %11, %13 : vector<8x128xf32>
    %c60 = arith.constant 60 : index
    %15 = memref.load %arg1[%c60] : memref<64xf32, #tpu.memory_space<smem>>
    %16 = vector.broadcast %15 : f32 to vector<8x128xf32>
    %17 = arith.addf %14, %16 : vector<8x128xf32>
    %c1 = arith.constant 1 : index
    %18 = memref.load %arg1[%c1] : memref<64xf32, #tpu.memory_space<smem>>
    %19 = vector.broadcast %18 : f32 to vector<8x128xf32>
    %20 = arith.mulf %3, %19 : vector<8x128xf32>
    %c21 = arith.constant 21 : index
    %21 = memref.load %arg1[%c21] : memref<64xf32, #tpu.memory_space<smem>>
    %22 = vector.broadcast %21 : f32 to vector<8x128xf32>
    %23 = arith.addf %20, %22 : vector<8x128xf32>
    %cst_1 = arith.constant 0.000000e+00 : f32
    %24 = vector.broadcast %cst_1 : f32 to vector<8x128xf32>
    %25 = arith.maximumf %23, %24 : vector<8x128xf32>
    %c41 = arith.constant 41 : index
    %26 = memref.load %arg1[%c41] : memref<64xf32, #tpu.memory_space<smem>>
    %27 = vector.broadcast %26 : f32 to vector<8x128xf32>
    %28 = arith.mulf %25, %27 : vector<8x128xf32>
    %29 = arith.addf %17, %28 : vector<8x128xf32>
    %c2 = arith.constant 2 : index
    %30 = memref.load %arg1[%c2] : memref<64xf32, #tpu.memory_space<smem>>
    %31 = vector.broadcast %30 : f32 to vector<8x128xf32>
    %32 = arith.mulf %3, %31 : vector<8x128xf32>
    %c22 = arith.constant 22 : index
    %33 = memref.load %arg1[%c22] : memref<64xf32, #tpu.memory_space<smem>>
    %34 = vector.broadcast %33 : f32 to vector<8x128xf32>
    %35 = arith.addf %32, %34 : vector<8x128xf32>
    %cst_2 = arith.constant 0.000000e+00 : f32
    %36 = vector.broadcast %cst_2 : f32 to vector<8x128xf32>
    %37 = arith.maximumf %35, %36 : vector<8x128xf32>
    %c42 = arith.constant 42 : index
    %38 = memref.load %arg1[%c42] : memref<64xf32, #tpu.memory_space<smem>>
    %39 = vector.broadcast %38 : f32 to vector<8x128xf32>
    %40 = arith.mulf %37, %39 : vector<8x128xf32>
    %41 = arith.addf %29, %40 : vector<8x128xf32>
    %c3 = arith.constant 3 : index
    %42 = memref.load %arg1[%c3] : memref<64xf32, #tpu.memory_space<smem>>
    %43 = vector.broadcast %42 : f32 to vector<8x128xf32>
    %44 = arith.mulf %3, %43 : vector<8x128xf32>
    %c23 = arith.constant 23 : index
    %45 = memref.load %arg1[%c23] : memref<64xf32, #tpu.memory_space<smem>>
    %46 = vector.broadcast %45 : f32 to vector<8x128xf32>
    %47 = arith.addf %44, %46 : vector<8x128xf32>
    %cst_3 = arith.constant 0.000000e+00 : f32
    %48 = vector.broadcast %cst_3 : f32 to vector<8x128xf32>
    %49 = arith.maximumf %47, %48 : vector<8x128xf32>
    %c43 = arith.constant 43 : index
    %50 = memref.load %arg1[%c43] : memref<64xf32, #tpu.memory_space<smem>>
    %51 = vector.broadcast %50 : f32 to vector<8x128xf32>
    %52 = arith.mulf %49, %51 : vector<8x128xf32>
    %53 = arith.addf %41, %52 : vector<8x128xf32>
    %c4 = arith.constant 4 : index
    %54 = memref.load %arg1[%c4] : memref<64xf32, #tpu.memory_space<smem>>
    %55 = vector.broadcast %54 : f32 to vector<8x128xf32>
    %56 = arith.mulf %3, %55 : vector<8x128xf32>
    %c24 = arith.constant 24 : index
    %57 = memref.load %arg1[%c24] : memref<64xf32, #tpu.memory_space<smem>>
    %58 = vector.broadcast %57 : f32 to vector<8x128xf32>
    %59 = arith.addf %56, %58 : vector<8x128xf32>
    %cst_4 = arith.constant 0.000000e+00 : f32
    %60 = vector.broadcast %cst_4 : f32 to vector<8x128xf32>
    %61 = arith.maximumf %59, %60 : vector<8x128xf32>
    %c44 = arith.constant 44 : index
    %62 = memref.load %arg1[%c44] : memref<64xf32, #tpu.memory_space<smem>>
    %63 = vector.broadcast %62 : f32 to vector<8x128xf32>
    %64 = arith.mulf %61, %63 : vector<8x128xf32>
    %65 = arith.addf %53, %64 : vector<8x128xf32>
    %c5 = arith.constant 5 : index
    %66 = memref.load %arg1[%c5] : memref<64xf32, #tpu.memory_space<smem>>
    %67 = vector.broadcast %66 : f32 to vector<8x128xf32>
    %68 = arith.mulf %3, %67 : vector<8x128xf32>
    %c25 = arith.constant 25 : index
    %69 = memref.load %arg1[%c25] : memref<64xf32, #tpu.memory_space<smem>>
    %70 = vector.broadcast %69 : f32 to vector<8x128xf32>
    %71 = arith.addf %68, %70 : vector<8x128xf32>
    %cst_5 = arith.constant 0.000000e+00 : f32
    %72 = vector.broadcast %cst_5 : f32 to vector<8x128xf32>
    %73 = arith.maximumf %71, %72 : vector<8x128xf32>
    %c45 = arith.constant 45 : index
    %74 = memref.load %arg1[%c45] : memref<64xf32, #tpu.memory_space<smem>>
    %75 = vector.broadcast %74 : f32 to vector<8x128xf32>
    %76 = arith.mulf %73, %75 : vector<8x128xf32>
    %77 = arith.addf %65, %76 : vector<8x128xf32>
    %c6 = arith.constant 6 : index
    %78 = memref.load %arg1[%c6] : memref<64xf32, #tpu.memory_space<smem>>
    %79 = vector.broadcast %78 : f32 to vector<8x128xf32>
    %80 = arith.mulf %3, %79 : vector<8x128xf32>
    %c26 = arith.constant 26 : index
    %81 = memref.load %arg1[%c26] : memref<64xf32, #tpu.memory_space<smem>>
    %82 = vector.broadcast %81 : f32 to vector<8x128xf32>
    %83 = arith.addf %80, %82 : vector<8x128xf32>
    %cst_6 = arith.constant 0.000000e+00 : f32
    %84 = vector.broadcast %cst_6 : f32 to vector<8x128xf32>
    %85 = arith.maximumf %83, %84 : vector<8x128xf32>
    %c46 = arith.constant 46 : index
    %86 = memref.load %arg1[%c46] : memref<64xf32, #tpu.memory_space<smem>>
    %87 = vector.broadcast %86 : f32 to vector<8x128xf32>
    %88 = arith.mulf %85, %87 : vector<8x128xf32>
    %89 = arith.addf %77, %88 : vector<8x128xf32>
    %c7 = arith.constant 7 : index
    %90 = memref.load %arg1[%c7] : memref<64xf32, #tpu.memory_space<smem>>
    %91 = vector.broadcast %90 : f32 to vector<8x128xf32>
    %92 = arith.mulf %3, %91 : vector<8x128xf32>
    %c27 = arith.constant 27 : index
    %93 = memref.load %arg1[%c27] : memref<64xf32, #tpu.memory_space<smem>>
    %94 = vector.broadcast %93 : f32 to vector<8x128xf32>
    %95 = arith.addf %92, %94 : vector<8x128xf32>
    %cst_7 = arith.constant 0.000000e+00 : f32
    %96 = vector.broadcast %cst_7 : f32 to vector<8x128xf32>
    %97 = arith.maximumf %95, %96 : vector<8x128xf32>
    %c47 = arith.constant 47 : index
    %98 = memref.load %arg1[%c47] : memref<64xf32, #tpu.memory_space<smem>>
    %99 = vector.broadcast %98 : f32 to vector<8x128xf32>
    %100 = arith.mulf %97, %99 : vector<8x128xf32>
    %101 = arith.addf %89, %100 : vector<8x128xf32>
    %c8 = arith.constant 8 : index
    %102 = memref.load %arg1[%c8] : memref<64xf32, #tpu.memory_space<smem>>
    %103 = vector.broadcast %102 : f32 to vector<8x128xf32>
    %104 = arith.mulf %3, %103 : vector<8x128xf32>
    %c28 = arith.constant 28 : index
    %105 = memref.load %arg1[%c28] : memref<64xf32, #tpu.memory_space<smem>>
    %106 = vector.broadcast %105 : f32 to vector<8x128xf32>
    %107 = arith.addf %104, %106 : vector<8x128xf32>
    %cst_8 = arith.constant 0.000000e+00 : f32
    %108 = vector.broadcast %cst_8 : f32 to vector<8x128xf32>
    %109 = arith.maximumf %107, %108 : vector<8x128xf32>
    %c48 = arith.constant 48 : index
    %110 = memref.load %arg1[%c48] : memref<64xf32, #tpu.memory_space<smem>>
    %111 = vector.broadcast %110 : f32 to vector<8x128xf32>
    %112 = arith.mulf %109, %111 : vector<8x128xf32>
    %113 = arith.addf %101, %112 : vector<8x128xf32>
    %c9 = arith.constant 9 : index
    %114 = memref.load %arg1[%c9] : memref<64xf32, #tpu.memory_space<smem>>
    %115 = vector.broadcast %114 : f32 to vector<8x128xf32>
    %116 = arith.mulf %3, %115 : vector<8x128xf32>
    %c29 = arith.constant 29 : index
    %117 = memref.load %arg1[%c29] : memref<64xf32, #tpu.memory_space<smem>>
    %118 = vector.broadcast %117 : f32 to vector<8x128xf32>
    %119 = arith.addf %116, %118 : vector<8x128xf32>
    %cst_9 = arith.constant 0.000000e+00 : f32
    %120 = vector.broadcast %cst_9 : f32 to vector<8x128xf32>
    %121 = arith.maximumf %119, %120 : vector<8x128xf32>
    %c49 = arith.constant 49 : index
    %122 = memref.load %arg1[%c49] : memref<64xf32, #tpu.memory_space<smem>>
    %123 = vector.broadcast %122 : f32 to vector<8x128xf32>
    %124 = arith.mulf %121, %123 : vector<8x128xf32>
    %125 = arith.addf %113, %124 : vector<8x128xf32>
    %c10 = arith.constant 10 : index
    %126 = memref.load %arg1[%c10] : memref<64xf32, #tpu.memory_space<smem>>
    %127 = vector.broadcast %126 : f32 to vector<8x128xf32>
    %128 = arith.mulf %3, %127 : vector<8x128xf32>
    %c30 = arith.constant 30 : index
    %129 = memref.load %arg1[%c30] : memref<64xf32, #tpu.memory_space<smem>>
    %130 = vector.broadcast %129 : f32 to vector<8x128xf32>
    %131 = arith.addf %128, %130 : vector<8x128xf32>
    %cst_10 = arith.constant 0.000000e+00 : f32
    %132 = vector.broadcast %cst_10 : f32 to vector<8x128xf32>
    %133 = arith.maximumf %131, %132 : vector<8x128xf32>
    %c50 = arith.constant 50 : index
    %134 = memref.load %arg1[%c50] : memref<64xf32, #tpu.memory_space<smem>>
    %135 = vector.broadcast %134 : f32 to vector<8x128xf32>
    %136 = arith.mulf %133, %135 : vector<8x128xf32>
    %137 = arith.addf %125, %136 : vector<8x128xf32>
    %c11 = arith.constant 11 : index
    %138 = memref.load %arg1[%c11] : memref<64xf32, #tpu.memory_space<smem>>
    %139 = vector.broadcast %138 : f32 to vector<8x128xf32>
    %140 = arith.mulf %3, %139 : vector<8x128xf32>
    %c31 = arith.constant 31 : index
    %141 = memref.load %arg1[%c31] : memref<64xf32, #tpu.memory_space<smem>>
    %142 = vector.broadcast %141 : f32 to vector<8x128xf32>
    %143 = arith.addf %140, %142 : vector<8x128xf32>
    %cst_11 = arith.constant 0.000000e+00 : f32
    %144 = vector.broadcast %cst_11 : f32 to vector<8x128xf32>
    %145 = arith.maximumf %143, %144 : vector<8x128xf32>
    %c51 = arith.constant 51 : index
    %146 = memref.load %arg1[%c51] : memref<64xf32, #tpu.memory_space<smem>>
    %147 = vector.broadcast %146 : f32 to vector<8x128xf32>
    %148 = arith.mulf %145, %147 : vector<8x128xf32>
    %149 = arith.addf %137, %148 : vector<8x128xf32>
    %c12 = arith.constant 12 : index
    %150 = memref.load %arg1[%c12] : memref<64xf32, #tpu.memory_space<smem>>
    %151 = vector.broadcast %150 : f32 to vector<8x128xf32>
    %152 = arith.mulf %3, %151 : vector<8x128xf32>
    %c32 = arith.constant 32 : index
    %153 = memref.load %arg1[%c32] : memref<64xf32, #tpu.memory_space<smem>>
    %154 = vector.broadcast %153 : f32 to vector<8x128xf32>
    %155 = arith.addf %152, %154 : vector<8x128xf32>
    %cst_12 = arith.constant 0.000000e+00 : f32
    %156 = vector.broadcast %cst_12 : f32 to vector<8x128xf32>
    %157 = arith.maximumf %155, %156 : vector<8x128xf32>
    %c52 = arith.constant 52 : index
    %158 = memref.load %arg1[%c52] : memref<64xf32, #tpu.memory_space<smem>>
    %159 = vector.broadcast %158 : f32 to vector<8x128xf32>
    %160 = arith.mulf %157, %159 : vector<8x128xf32>
    %161 = arith.addf %149, %160 : vector<8x128xf32>
    %c13 = arith.constant 13 : index
    %162 = memref.load %arg1[%c13] : memref<64xf32, #tpu.memory_space<smem>>
    %163 = vector.broadcast %162 : f32 to vector<8x128xf32>
    %164 = arith.mulf %3, %163 : vector<8x128xf32>
    %c33 = arith.constant 33 : index
    %165 = memref.load %arg1[%c33] : memref<64xf32, #tpu.memory_space<smem>>
    %166 = vector.broadcast %165 : f32 to vector<8x128xf32>
    %167 = arith.addf %164, %166 : vector<8x128xf32>
    %cst_13 = arith.constant 0.000000e+00 : f32
    %168 = vector.broadcast %cst_13 : f32 to vector<8x128xf32>
    %169 = arith.maximumf %167, %168 : vector<8x128xf32>
    %c53 = arith.constant 53 : index
    %170 = memref.load %arg1[%c53] : memref<64xf32, #tpu.memory_space<smem>>
    %171 = vector.broadcast %170 : f32 to vector<8x128xf32>
    %172 = arith.mulf %169, %171 : vector<8x128xf32>
    %173 = arith.addf %161, %172 : vector<8x128xf32>
    %c14 = arith.constant 14 : index
    %174 = memref.load %arg1[%c14] : memref<64xf32, #tpu.memory_space<smem>>
    %175 = vector.broadcast %174 : f32 to vector<8x128xf32>
    %176 = arith.mulf %3, %175 : vector<8x128xf32>
    %c34 = arith.constant 34 : index
    %177 = memref.load %arg1[%c34] : memref<64xf32, #tpu.memory_space<smem>>
    %178 = vector.broadcast %177 : f32 to vector<8x128xf32>
    %179 = arith.addf %176, %178 : vector<8x128xf32>
    %cst_14 = arith.constant 0.000000e+00 : f32
    %180 = vector.broadcast %cst_14 : f32 to vector<8x128xf32>
    %181 = arith.maximumf %179, %180 : vector<8x128xf32>
    %c54 = arith.constant 54 : index
    %182 = memref.load %arg1[%c54] : memref<64xf32, #tpu.memory_space<smem>>
    %183 = vector.broadcast %182 : f32 to vector<8x128xf32>
    %184 = arith.mulf %181, %183 : vector<8x128xf32>
    %185 = arith.addf %173, %184 : vector<8x128xf32>
    %c15 = arith.constant 15 : index
    %186 = memref.load %arg1[%c15] : memref<64xf32, #tpu.memory_space<smem>>
    %187 = vector.broadcast %186 : f32 to vector<8x128xf32>
    %188 = arith.mulf %3, %187 : vector<8x128xf32>
    %c35 = arith.constant 35 : index
    %189 = memref.load %arg1[%c35] : memref<64xf32, #tpu.memory_space<smem>>
    %190 = vector.broadcast %189 : f32 to vector<8x128xf32>
    %191 = arith.addf %188, %190 : vector<8x128xf32>
    %cst_15 = arith.constant 0.000000e+00 : f32
    %192 = vector.broadcast %cst_15 : f32 to vector<8x128xf32>
    %193 = arith.maximumf %191, %192 : vector<8x128xf32>
    %c55 = arith.constant 55 : index
    %194 = memref.load %arg1[%c55] : memref<64xf32, #tpu.memory_space<smem>>
    %195 = vector.broadcast %194 : f32 to vector<8x128xf32>
    %196 = arith.mulf %193, %195 : vector<8x128xf32>
    %197 = arith.addf %185, %196 : vector<8x128xf32>
    %c16 = arith.constant 16 : index
    %198 = memref.load %arg1[%c16] : memref<64xf32, #tpu.memory_space<smem>>
    %199 = vector.broadcast %198 : f32 to vector<8x128xf32>
    %200 = arith.mulf %3, %199 : vector<8x128xf32>
    %c36 = arith.constant 36 : index
    %201 = memref.load %arg1[%c36] : memref<64xf32, #tpu.memory_space<smem>>
    %202 = vector.broadcast %201 : f32 to vector<8x128xf32>
    %203 = arith.addf %200, %202 : vector<8x128xf32>
    %cst_16 = arith.constant 0.000000e+00 : f32
    %204 = vector.broadcast %cst_16 : f32 to vector<8x128xf32>
    %205 = arith.maximumf %203, %204 : vector<8x128xf32>
    %c56 = arith.constant 56 : index
    %206 = memref.load %arg1[%c56] : memref<64xf32, #tpu.memory_space<smem>>
    %207 = vector.broadcast %206 : f32 to vector<8x128xf32>
    %208 = arith.mulf %205, %207 : vector<8x128xf32>
    %209 = arith.addf %197, %208 : vector<8x128xf32>
    %c17 = arith.constant 17 : index
    %210 = memref.load %arg1[%c17] : memref<64xf32, #tpu.memory_space<smem>>
    %211 = vector.broadcast %210 : f32 to vector<8x128xf32>
    %212 = arith.mulf %3, %211 : vector<8x128xf32>
    %c37 = arith.constant 37 : index
    %213 = memref.load %arg1[%c37] : memref<64xf32, #tpu.memory_space<smem>>
    %214 = vector.broadcast %213 : f32 to vector<8x128xf32>
    %215 = arith.addf %212, %214 : vector<8x128xf32>
    %cst_17 = arith.constant 0.000000e+00 : f32
    %216 = vector.broadcast %cst_17 : f32 to vector<8x128xf32>
    %217 = arith.maximumf %215, %216 : vector<8x128xf32>
    %c57 = arith.constant 57 : index
    %218 = memref.load %arg1[%c57] : memref<64xf32, #tpu.memory_space<smem>>
    %219 = vector.broadcast %218 : f32 to vector<8x128xf32>
    %220 = arith.mulf %217, %219 : vector<8x128xf32>
    %221 = arith.addf %209, %220 : vector<8x128xf32>
    %c18 = arith.constant 18 : index
    %222 = memref.load %arg1[%c18] : memref<64xf32, #tpu.memory_space<smem>>
    %223 = vector.broadcast %222 : f32 to vector<8x128xf32>
    %224 = arith.mulf %3, %223 : vector<8x128xf32>
    %c38 = arith.constant 38 : index
    %225 = memref.load %arg1[%c38] : memref<64xf32, #tpu.memory_space<smem>>
    %226 = vector.broadcast %225 : f32 to vector<8x128xf32>
    %227 = arith.addf %224, %226 : vector<8x128xf32>
    %cst_18 = arith.constant 0.000000e+00 : f32
    %228 = vector.broadcast %cst_18 : f32 to vector<8x128xf32>
    %229 = arith.maximumf %227, %228 : vector<8x128xf32>
    %c58 = arith.constant 58 : index
    %230 = memref.load %arg1[%c58] : memref<64xf32, #tpu.memory_space<smem>>
    %231 = vector.broadcast %230 : f32 to vector<8x128xf32>
    %232 = arith.mulf %229, %231 : vector<8x128xf32>
    %233 = arith.addf %221, %232 : vector<8x128xf32>
    %c19 = arith.constant 19 : index
    %234 = memref.load %arg1[%c19] : memref<64xf32, #tpu.memory_space<smem>>
    %235 = vector.broadcast %234 : f32 to vector<8x128xf32>
    %236 = arith.mulf %3, %235 : vector<8x128xf32>
    %c39 = arith.constant 39 : index
    %237 = memref.load %arg1[%c39] : memref<64xf32, #tpu.memory_space<smem>>
    %238 = vector.broadcast %237 : f32 to vector<8x128xf32>
    %239 = arith.addf %236, %238 : vector<8x128xf32>
    %cst_19 = arith.constant 0.000000e+00 : f32
    %240 = vector.broadcast %cst_19 : f32 to vector<8x128xf32>
    %241 = arith.maximumf %239, %240 : vector<8x128xf32>
    %c59 = arith.constant 59 : index
    %242 = memref.load %arg1[%c59] : memref<64xf32, #tpu.memory_space<smem>>
    %243 = vector.broadcast %242 : f32 to vector<8x128xf32>
    %244 = arith.mulf %241, %243 : vector<8x128xf32>
    %245 = arith.addf %233, %244 : vector<8x128xf32>
    %246 = arith.index_cast %1 : i32 to index
    %c0_20 = arith.constant 0 : index
    %247 = vector.load %arg3[%246, %c0_20] : memref<8x128xf32, #tpu.memory_space<vmem>>, vector<8x128xf32>
    tpu.vector_store %arg3[%246, %c0_20], %245 {strides = array<i32>} : memref<8x128xf32, #tpu.memory_space<vmem>>, vector<8x128xf32>,
    %c1_i32 = arith.constant 1 : i32
    return
  }
  func.func @transform_0(%arg0: i32) -> i32 {
    %c0_i32 = arith.constant 0 : i32
    %c0_i32_0 = arith.constant 0 : i32
    return %c0_i32 : i32
  }
  func.func @transform_1(%arg0: i32) -> (i32, i32) {
    %c0_i32 = arith.constant 0 : i32
    %c0_i32_0 = arith.constant 0 : i32
    return %arg0, %c0_i32 : i32, i32
  }
  func.func @transform_2(%arg0: i32) -> (i32, i32) {
    %c0_i32 = arith.constant 0 : i32
    %c0_i32_0 = arith.constant 0 : i32
    return %arg0, %c0_i32 : i32, i32
  }
}

</mosaic_0001>

<bundles_post_ra>
// kernel: net_forward.1
= control target key start
LH: loop header
LB: loop body
LE: loop exit
PB: predicated region body
PF: predicated region fallthrough
CT: control target
= control target key end

     0   :  { %7 = vsyncpa [#allocation4], 0  ;;  %s464_s0 = inlined_call_operand.vmem [shape: f32[64], index: 0, kind: input, shape index: {}]   ;;  %s465_s1 = inlined_call_operand.vmem [shape: f32[8,128], index: 1, kind: input, shape index: {}]   ;;  %s466_s2 = inlined_call_operand.hbm [shape: f32[8,128], index: 2, kind: output, shape index: {}]  }
   0x1   :  { %8 = vsyncpa [#allocation3], 0  ;;  %s14_s11 = sshll.u32 %s464_s0, 4  ;;  %s368_s12 = smov [#allocation2]   ;;  %s15_s11 = int_to_ptr.vmem [resolvable:$true] %s14_s11 }
   0x2   :  { %17 = dma.vmem_to_smem %s15_s11, 16, %s368_s12, [#allocation4]  }
   0x3   :  { %364 = dma.done.wait [#allocation4], 16  }
   0x4   :  { %365 = vsyncadd [#allocation4], 4294967280 }
   0x5   :  { %24 = sfence }
   0x6   :  { %s26_s13 = sld [smem:[#allocation2]]  ;;  %v391_v0 = vld [vmem:[%s465_s1] sm:$0xff] }
   0x7   :  { %s266_s14 = sld [smem:[#allocation2 + $0x14]] }
   0x8   :  { %s267_s15 = sld [smem:[#allocation2 + $0x28]] }
   0x9   :  { %s268_s16 = sld [smem:[#allocation2 + $0x3c]] }
   0xa   :  { %s269_s19 = sld [smem:[#allocation2 + $0x1]] }
   0xb   :  { %s270_s20 = sld [smem:[#allocation2 + $0x15]] }
   0xc   :  { %v27_v1 = vstv %s26_s13  ;;  %s271_s21 = sld [smem:[#allocation2 + $0x29]] }
   0xd   :  { %v28_v2 = vmul.f32 %v27_v1, %v391_v0  ;;  %v30_v3 = vstv %s266_s14  ;;  %s272_s0 = sld [smem:[#allocation2 + $0x2]] }
   0xe   :  { %s273_s22 = sld [smem:[#allocation2 + $0x16]]  ;;  %v34_v5 = vstv %s267_s15 }
   0xf   :  { %v31_v4 = vadd.f32 %v30_v3, %v28_v2  ;;  %s394_s23 = sld [smem:[#allocation2 + $0x2a]]  ;;  %v37_v10 = vstv %s268_s16 }
  0x10   :  { %v40_v6 = vstv %s269_s19  ;;  %s275_s24 = sld [smem:[#allocation2 + $0x3]] }
  0x11   :  { %v32_v7 = vmax.f32 %v31_v4, 0.0  ;;  %v41_v8 = vmul.f32 %v40_v6, %v391_v0  ;;  %v43_v9 = vstv %s270_s20  ;;  %s276_s1 = sld [smem:[#allocation2 + $0x17]] }
  0x12   :  { %s397_s25 = sld [smem:[#allocation2 + $0x2b]]  ;;  %v47_v14 = vstv %s271_s21 }
  0x13   :  { %v35_v11 = vmul.f32 %v34_v5, %v32_v7  ;;  %v44_v12 = vadd.f32 %v43_v9, %v41_v8  ;;  %v51_v13 = vstv %s272_s0  ;;  %s278_s26 = sld [smem:[#allocation2 + $0x4]] }
  0x14   :  { %v52_v15 = vmul.f32 %v51_v13, %v391_v0  ;;  %v54_v16 = vstv %s273_s22  ;;  %s279_s27 = sld [smem:[#allocation2 + $0x18]] }
  0x15   :  { %v38_v17 = vadd.f32 %v37_v10, %v35_v11  ;;  %v45_v18 = vmax.f32 %v44_v12, 0.0  ;;  %s400_s28 = sld [smem:[#allocation2 + $0x2c]]  ;;  %v58_v22 = vstv %s394_s23 }
  0x16   :  { %v55_v19 = vadd.f32 %v54_v16, %v52_v15  ;;  %v62_v20 = vstv %s275_s24  ;;  %s281_s29 = sld [smem:[#allocation2 + $0x5]] }
  0x17   :  { %v48_v21 = vmul.f32 %v47_v14, %v45_v18  ;;  %v63_v23 = vmul.f32 %v62_v20, %v391_v0  ;;  %v65_v24 = vstv %s276_s1  ;;  %s282_s30 = sld [smem:[#allocation2 + $0x19]] }
  0x18   :  { %v56_v25 = vmax.f32 %v55_v19, 0.0  ;;  %s404_s3 = sld [smem:[#allocation2 + $0x2d]]  ;;  %v69_v30 = vstv %s397_s25 }
  0x19   :  { %v49_v26 = vadd.f32 %v48_v21, %v38_v17  ;;  %v66_v27 = vadd.f32 %v65_v24, %v63_v23  ;;  %v73_v28 = vstv %s278_s26  ;;  %s284_s4 = sld [smem:[#allocation2 + $0x6]] }
  0x1a   :  { %v59_v29 = vmul.f32 %v58_v22, %v56_v25  ;;  %v74_v31 = vmul.f32 %v73_v28, %v391_v0  ;;  %v76_v32 = vstv %s279_s27  ;;  %s285_s5 = sld [smem:[#allocation2 + $0x1a]] }
  0x1b   :  { %v67_v33 = vmax.f32 %v66_v27, 0.0  ;;  %s408_s6 = sld [smem:[#allocation2 + $0x2e]]  ;;  %v80_v38 = vstv %s400_s28 }
  0x1c   :  { %v60_v34 = vadd.f32 %v59_v29, %v49_v26  ;;  %v77_v35 = vadd.f32 %v76_v32, %v74_v31  ;;  %v84_v36 = vstv %s281_s29  ;;  %s287_s7 = sld [smem:[#allocation2 + $0x7]] }
  0x1d   :  { %v70_v37 = vmul.f32 %v69_v30, %v67_v33  ;;  %v85_v39 = vmul.f32 %v84_v36, %v391_v0  ;;  %v87_v40 = vstv %s282_s30  ;;  %s288_s8 = sld [smem:[#allocation2 + $0x1b]] }
  0x1e   :  { %v78_v41 = vmax.f32 %v77_v35, 0.0  ;;  %s412_s9 = sld [smem:[#allocation2 + $0x2f]]  ;;  %v91_v46 = vstv %s404_s3 }
  0x1f   :  { %v71_v42 = vadd.f32 %v70_v37, %v60_v34  ;;  %v88_v43 = vadd.f32 %v87_v40, %v85_v39  ;;  %v95_v44 = vstv %s284_s4  ;;  %s290_s10 = sld [smem:[#allocation2 + $0x8]] }
  0x20   :  { %v81_v45 = vmul.f32 %v80_v38, %v78_v41  ;;  %v96_v47 = vmul.f32 %v95_v44, %v391_v0  ;;  %v98_v48 = vstv %s285_s5  ;;  %s291_s11 = sld [smem:[#allocation2 + $0x1c]] }
  0x21   :  { %v89_v49 = vmax.f32 %v88_v43, 0.0  ;;  %s416_s12 = sld [smem:[#allocation2 + $0x30]]  ;;  %v102_v54 = vstv %s408_s6 }
  0x22   :  { %v82_v50 = vadd.f32 %v81_v45, %v71_v42  ;;  %v99_v51 = vadd.f32 %v98_v48, %v96_v47  ;;  %v106_v52 = vstv %s287_s7  ;;  %s293_s13 = sld [smem:[#allocation2 + $0x9]] }
  0x23   :  { %v92_v53 = vmul.f32 %v91_v46, %v89_v49  ;;  %v107_v55 = vmul.f32 %v106_v52, %v391_v0  ;;  %v109_v56 = vstv %s288_s8  ;;  %s294_s14 = sld [smem:[#allocation2 + $0x1d]] }
  0x24   :  { %v100_v57 = vmax.f32 %v99_v51, 0.0  ;;  %s420_s15 = sld [smem:[#allocation2 + $0x31]]  ;;  %v113_v62 = vstv %s412_s9 }
  0x25   :  { %v93_v58 = vadd.f32 %v92_v53, %v82_v50  ;;  %v110_v59 = vadd.f32 %v109_v56, %v107_v55  ;;  %v117_v60 = vstv %s290_s10  ;;  %s296_s16 = sld [smem:[#allocation2 + $0xa]] }
  0x26   :  { %v103_v61 = vmul.f32 %v102_v54, %v100_v57  ;;  %v118_v63 = vmul.f32 %v117_v60, %v391_v0  ;;  %v120_v1 = vstv %s291_s11  ;;  %s297_s17 = sld [smem:[#allocation2 + $0x1e]] }
  0x27   :  { %v111_v2 = vmax.f32 %v110_v59, 0.0  ;;  %s424_s18 = sld [smem:[#allocation2 + $0x32]]  ;;  %v124_v7 = vstv %s416_s12 }
  0x28   :  { %v104_v3 = vadd.f32 %v103_v61, %v93_v58  ;;  %v121_v4 = vadd.f32 %v120_v1, %v118_v63  ;;  %v128_v5 = vstv %s293_s13  ;;  %s299_s19 = sld [smem:[#allocation2 + $0xb]] }
  0x29   :  { %v114_v6 = vmul.f32 %v113_v62, %v111_v2  ;;  %v129_v8 = vmul.f32 %v128_v5, %v391_v0  ;;  %v131_v9 = vstv %s294_s14  ;;  %s300_s20 = sld [smem:[#allocation2 + $0x1f]] }
  0x2a   :  { %v122_v10 = vmax.f32 %v121_v4, 0.0  ;;  %s428_s21 = sld [smem:[#allocation2 + $0x33]]  ;;  %v135_v15 = vstv %s420_s15 }
  0x2b   :  { %v115_v11 = vadd.f32 %v114_v6, %v104_v3  ;;  %v132_v12 = vadd.f32 %v131_v9, %v129_v8  ;;  %v139_v13 = vstv %s296_s16  ;;  %s302_s0 = sld [smem:[#allocation2 + $0xc]]  ;;  %s369_s16 = smov [#allocation5]  }
  0x2c   :  { %v125_v14 = vmul.f32 %v124_v7, %v122_v10  ;;  %v140_v16 = vmul.f32 %v139_v13, %v391_v0  ;;  %v142_v17 = vstv %s297_s17  ;;  %s303_s22 = sld [smem:[#allocation2 + $0x20]]  ;;  %s254_s17 = sshll.u32 %s369_s16, 4  ;;  %s255_s17 = int_to_ptr.vmem [resolvable:$true] %s254_s17 }
  0x2d   :  { %v133_v18 = vmax.f32 %v132_v12, 0.0  ;;  %s432_s23 = sld [smem:[#allocation2 + $0x34]]  ;;  %v146_v23 = vstv %s424_s18 }
  0x2e   :  { %v126_v19 = vadd.f32 %v125_v14, %v115_v11  ;;  %v143_v20 = vadd.f32 %v142_v17, %v140_v16  ;;  %v150_v21 = vstv %s299_s19  ;;  %s305_s24 = sld [smem:[#allocation2 + $0xd]] }
  0x2f   :  { %v136_v22 = vmul.f32 %v135_v15, %v133_v18  ;;  %v151_v24 = vmul.f32 %v150_v21, %v391_v0  ;;  %v153_v25 = vstv %s300_s20  ;;  %s306_s1 = sld [smem:[#allocation2 + $0x21]]  ;;  %s256_s20 = sshll.u32 %s466_s2, 4  ;;  %s257_s20 = int_to_ptr.hbm [resolvable:$true] %s256_s20 }
  0x30   :  { %v144_v26 = vmax.f32 %v143_v20, 0.0  ;;  %s436_s25 = sld [smem:[#allocation2 + $0x35]]  ;;  %v157_v31 = vstv %s428_s21 }
  0x31   :  { %v137_v27 = vadd.f32 %v136_v22, %v126_v19  ;;  %v154_v28 = vadd.f32 %v153_v25, %v151_v24  ;;  %v161_v29 = vstv %s302_s0  ;;  %s308_s26 = sld [smem:[#allocation2 + $0xe]] }
  0x32   :  { %v147_v30 = vmul.f32 %v146_v23, %v144_v26  ;;  %v162_v32 = vmul.f32 %v161_v29, %v391_v0  ;;  %v164_v33 = vstv %s303_s22  ;;  %s309_s27 = sld [smem:[#allocation2 + $0x22]] }
  0x33   :  { %v155_v34 = vmax.f32 %v154_v28, 0.0  ;;  %s440_s28 = sld [smem:[#allocation2 + $0x36]]  ;;  %v168_v39 = vstv %s432_s23 }
  0x34   :  { %v148_v35 = vadd.f32 %v147_v30, %v137_v27  ;;  %v165_v36 = vadd.f32 %v164_v33, %v162_v32  ;;  %v172_v37 = vstv %s305_s24  ;;  %s311_s29 = sld [smem:[#allocation2 + $0xf]] }
  0x35   :  { %v158_v38 = vmul.f32 %v157_v31, %v155_v34  ;;  %v173_v40 = vmul.f32 %v172_v37, %v391_v0  ;;  %v175_v41 = vstv %s306_s1  ;;  %s312_s30 = sld [smem:[#allocation2 + $0x23]] }
  0x36   :  { %v166_v42 = vmax.f32 %v165_v36, 0.0  ;;  %s444_s3 = sld [smem:[#allocation2 + $0x37]]  ;;  %v179_v47 = vstv %s436_s25 }
  0x37   :  { %v159_v43 = vadd.f32 %v158_v38, %v148_v35  ;;  %v176_v44 = vadd.f32 %v175_v41, %v173_v40  ;;  %v183_v45 = vstv %s308_s26  ;;  %s314_s4 = sld [smem:[#allocation2 + $0x10]] }
  0x38   :  { %v169_v46 = vmul.f32 %v168_v39, %v166_v42  ;;  %v184_v48 = vmul.f32 %v183_v45, %v391_v0  ;;  %v186_v49 = vstv %s309_s27  ;;  %s315_s5 = sld [smem:[#allocation2 + $0x24]] }
  0x39   :  { %v177_v50 = vmax.f32 %v176_v44, 0.0  ;;  %s448_s6 = sld [smem:[#allocation2 + $0x38]]  ;;  %v190_v55 = vstv %s440_s28 }
  0x3a   :  { %v170_v51 = vadd.f32 %v169_v46, %v159_v43  ;;  %v187_v52 = vadd.f32 %v186_v49, %v184_v48  ;;  %v194_v53 = vstv %s311_s29  ;;  %s317_s7 = sld [smem:[#allocation2 + $0x11]] }
  0x3b   :  { %v180_v54 = vmul.f32 %v179_v47, %v177_v50  ;;  %v195_v56 = vmul.f32 %v194_v53, %v391_v0  ;;  %v197_v57 = vstv %s312_s30  ;;  %s318_s8 = sld [smem:[#allocation2 + $0x25]] }
  0x3c   :  { %v188_v58 = vmax.f32 %v187_v52, 0.0  ;;  %s452_s9 = sld [smem:[#allocation2 + $0x39]]  ;;  %v201_v63 = vstv %s444_s3 }
  0x3d   :  { %v181_v59 = vadd.f32 %v180_v54, %v170_v51  ;;  %v198_v60 = vadd.f32 %v197_v57, %v195_v56  ;;  %v205_v61 = vstv %s314_s4  ;;  %s320_s10 = sld [smem:[#allocation2 + $0x12]] }
  0x3e   :  { %v191_v62 = vmul.f32 %v190_v55, %v188_v58  ;;  %v206_v1 = vmul.f32 %v205_v61, %v391_v0  ;;  %v208_v2 = vstv %s315_s5  ;;  %s321_s11 = sld [smem:[#allocation2 + $0x26]] }
  0x3f   :  { %v199_v3 = vmax.f32 %v198_v60, 0.0  ;;  %s322_s12 = sld [smem:[#allocation2 + $0x3a]]  ;;  %v212_v8 = vstv %s448_s6 }
  0x40   :  { %v192_v4 = vadd.f32 %v191_v62, %v181_v59  ;;  %v209_v5 = vadd.f32 %v208_v2, %v206_v1  ;;  %v216_v6 = vstv %s317_s7  ;;  %s323_s13 = sld [smem:[#allocation2 + $0x13]] }
  0x41   :  { %v202_v7 = vmul.f32 %v201_v63, %v199_v3  ;;  %v217_v9 = vmul.f32 %v216_v6, %v391_v0  ;;  %v219_v10 = vstv %s318_s8  ;;  %s324_s14 = sld [smem:[#allocation2 + $0x27]] }
  0x42   :  { %v210_v11 = vmax.f32 %v209_v5, 0.0  ;;  %s325_s15 = sld [smem:[#allocation2 + $0x3b]]  ;;  %v223_v16 = vstv %s452_s9 }
  0x43   :  { %v203_v12 = vadd.f32 %v202_v7, %v192_v4  ;;  %v220_v13 = vadd.f32 %v219_v10, %v217_v9  ;;  %v227_v14 = vstv %s320_s10 }
  0x44   :  { %v213_v15 = vmul.f32 %v212_v8, %v210_v11  ;;  %v228_v17 = vmul.f32 %v227_v14, %v391_v0  ;;  %v230_v18 = vstv %s321_s11 }
  0x45   :  { %v221_v19 = vmax.f32 %v220_v13, 0.0  ;;  %v234_v24 = vstv %s322_s12 }
  0x46   :  { %v214_v20 = vadd.f32 %v213_v15, %v203_v12  ;;  %v231_v21 = vadd.f32 %v230_v18, %v228_v17  ;;  %v238_v22 = vstv %s323_s13 }
  0x47   :  { %v224_v23 = vmul.f32 %v223_v16, %v221_v19  ;;  %v239_v25 = vmul.f32 %v238_v22, %v391_v0  ;;  %v241_v26 = vstv %s324_s14 }
  0x48   :  { %v232_v27 = vmax.f32 %v231_v21, 0.0  ;;  %v245_v31 = vstv %s325_s15 }
  0x49   :  { %v225_v28 = vadd.f32 %v224_v23, %v214_v20  ;;  %v242_v29 = vadd.f32 %v241_v26, %v239_v25 }
  0x4a   :  { %v235_v30 = vmul.f32 %v234_v24, %v232_v27 }
  0x4b   :  { %v243_v32 = vmax.f32 %v242_v29, 0.0 }
  0x4c   :  { %v236_v33 = vadd.f32 %v235_v30, %v225_v28 }
  0x4d   :  { %v246_v34 = vmul.f32 %v245_v31, %v243_v32 }
  0x4f   :  { %v247_v35 = vadd.f32 %v246_v34, %v236_v33 }
  0x51   :  { %248 = vst [vmem:[#allocation5] sm:$0xff] %v247_v35 }
  0x52   :  { %259 = dma.vmem_to_hbm [thread:$0]  %s255_s17, 128, %s257_s20, [#allocation3]  }
  0x53   :  { %366 = dma.done.wait [#allocation3], 128  }
  0x54   :  { %367 = vsyncadd [#allocation3], 4294967168 }
  0x55   :  { %264 = vsyncpa [#allocation3], 1 }
  0x56   :  { %265 = vsyncpa [#allocation4], 1 }

</bundles_post_ra>
